<compile_context>
chip_gen: v6e
topology: v6e:2x2x1
jax: 0.10.0
libtpu: 0.0.40
codegen_flags: <defaults>
</compile_context>

<pallas_src>
import jax
import jax.numpy as jnp
from jax.experimental import pallas as pl
from jax.experimental.pallas import tpu as pltpu


VMEM_LIMIT = 32 * 1024 * 1024  # safe on v5e/v6e/v7x; raises v5e's 16MiB default


# ---------------------------------------------------------------------------
# helpers
# ---------------------------------------------------------------------------
def _round_up(x, m):
    return (x + m - 1) // m * m


def _pad_to(x, shape):
    pads = [(0, s - d) for d, s in zip(x.shape, shape)]
    if all(p == (0, 0) for p in pads):
        return x
    return jnp.pad(x, pads)


def _pick_tile(dim, cap):
    """Largest MXU/vreg-friendly tile <= cap that divides dim (else full dim)."""
    for cand in (512, 256, 128, 64, 32, 16, 8):
        if cand <= cap and dim % cand == 0:
            return cand
    return dim


def _largest_divisor_leq(n, cap):
    for d in range(min(n, cap), 0, -1):
        if n % d == 0:
            return d
    return 1


# ---------------------------------------------------------------------------
# tiled matmul + bias kernel (used for the hoisted input / output projections)
# ---------------------------------------------------------------------------
def matmul_bias_kernel(a_ref, b_ref, bias_ref, o_ref, acc_ref):
    k = pl.program_id(2)

    @pl.when(k == 0)
    def _():
        acc_ref[...] = jnp.zeros_like(acc_ref)

    acc_ref[...] += jnp.dot(a_ref[...], b_ref[...],
                            preferred_element_type=jnp.float32)

    @pl.when(k == pl.num_programs(2) - 1)
    def _():
        o_ref[...] = (acc_ref[...] + bias_ref[...]).astype(o_ref.dtype)


def pallas_matmul_bias(a, b, bias, *, tm_cap=256, tn_cap=256, tk_cap=512):
    """out = a @ b + bias, with internal padding to (8,128)-aligned tiles."""
    M, K = a.shape
    K2, N = b.shape
    assert K == K2 and bias.shape == (1, N)

    Mp, Kp, Np = _round_up(M, 8), _round_up(K, 128), _round_up(N, 128)
    a_p = _pad_to(a, (Mp, Kp)).astype(jnp.float32)
    b_p = _pad_to(b, (Kp, Np)).astype(jnp.float32)
    bias_p = _pad_to(bias, (1, Np)).astype(jnp.float32)

    tm = _pick_tile(Mp, tm_cap)
    tn = _pick_tile(Np, tn_cap)
    tk = _pick_tile(Kp, tk_cap)

    out = pl.pallas_call(
        matmul_bias_kernel,
        out_shape=jax.ShapeDtypeStruct((Mp, Np), jnp.float32),
        grid_spec=pltpu.PrefetchScalarGridSpec(
            num_scalar_prefetch=0,
            grid=(Mp // tm, Np // tn, Kp // tk),
            in_specs=[
                pl.BlockSpec((tm, tk), lambda i, j, k: (i, k)),
                pl.BlockSpec((tk, tn), lambda i, j, k: (k, j)),
                pl.BlockSpec((1, tn), lambda i, j, k: (0, j)),
            ],
            out_specs=pl.BlockSpec((tm, tn), lambda i, j, k: (i, j)),
            scratch_shapes=[pltpu.VMEM((tm, tn), jnp.float32)],
        ),
        compiler_params=pltpu.CompilerParams(
            dimension_semantics=("parallel", "parallel", "arbitrary"),
            vmem_limit_bytes=VMEM_LIMIT,
        ),
    )(a_p, b_p, bias_p)
    return out[:M, :N]


# ---------------------------------------------------------------------------
# recurrent kernel: h_t = tanh(u_t + h_{t-1} @ W_hh), emits all hidden states
# ---------------------------------------------------------------------------
def rnn_recurrence(u, w_hh_p):
    """u: (T, B_pad, H_pad) pre-activations (already include x@W_ih + biases).
    w_hh_p: (H_pad, H_pad). Returns hidden states (T, B_pad, H_pad)."""
    T, B_pad, H_pad = u.shape
    t_chunk = _largest_divisor_leq(T, 16)
    n_chunks = T // t_chunk
    # Split batch across TensorCores only if each shard keeps >= 8 sublanes.
    n_shards = 2 if (B_pad % 16 == 0) else 1
    b_shard = B_pad // n_shards

    def kernel(u_ref, whh_ref, hid_ref, h_carry):
        @pl.when(pl.program_id(1) == 0)
        def _():
            h_carry[...] = jnp.zeros_like(h_carry)

        whh = whh_ref[...]
        h = h_carry[...]
        # statically unrolled time steps within the chunk: only the serial
        # (B, H) x (H, H) matmul + tanh lives inside the recurrence
        for i in range(t_chunk):
            h = jnp.tanh(u_ref[i] + jnp.dot(h, whh,
                                            preferred_element_type=jnp.float32))
            hid_ref[i] = h
        h_carry[...] = h

    return pl.pallas_call(
        kernel,
        out_shape=jax.ShapeDtypeStruct((T, B_pad, H_pad), jnp.float32),
        grid_spec=pltpu.PrefetchScalarGridSpec(
            num_scalar_prefetch=0,
            grid=(n_shards, n_chunks),
            in_specs=[
                pl.BlockSpec((t_chunk, b_shard, H_pad), lambda s, c: (c, s, 0)),
                pl.BlockSpec((H_pad, H_pad), lambda s, c: (0, 0)),
            ],
            out_specs=pl.BlockSpec((t_chunk, b_shard, H_pad),
                                   lambda s, c: (c, s, 0)),
            scratch_shapes=[pltpu.VMEM((b_shard, H_pad), jnp.float32)],
        ),
        compiler_params=pltpu.CompilerParams(
            # batch shards are independent (parallel); time chunks are the
            # serial recurrence (arbitrary) and MUST stay sequential.
            dimension_semantics=("parallel", "arbitrary"),
            vmem_limit_bytes=VMEM_LIMIT,
        ),
    )(u, w_hh_p)


# ---------------------------------------------------------------------------
# full forward pass
# ---------------------------------------------------------------------------
def net_forward(x_ids, params):
    """x_ids: (B, T) int32 token ids. Returns (B*T, vocab) float32 logits."""
    emb = params["embedding"]        # (V, D_in)
    w_ih_t = params["w_ih_t"]        # (D_in, H)
    w_hh_t = params["w_hh_t"]        # (H, H)
    b_rnn = params["b_rnn"]          # (1, H)  == b_ih + b_hh
    w_lin_t = params["w_lin_t"]      # (H, V)
    b_lin = params["b_lin"]          # (1, V)

    B, T = x_ids.shape
    V, D_in = emb.shape
    H = w_hh_t.shape[0]

    H_pad = _round_up(H, 128)
    B_pad = _round_up(B, 8)

    # 1) Hoisted input projection: project the embedding table ONCE.
    #    gather(emb)[x] @ W_ih + b  ==  gather(emb @ W_ih + b)[x]
    w_ih_p = _pad_to(w_ih_t, (D_in, H_pad))
    b_rnn_p = _pad_to(b_rnn, (1, H_pad))
    e_proj = pallas_matmul_bias(emb, w_ih_p, b_rnn_p)        # (V, H_pad)

    # 2) Token-id gather (glue), time-major directly (no big-tensor transpose),
    #    batch padded to a sublane multiple.
    # TODO(synk): embedding gather stays in plain JAX; a data-dependent DMA
    #             gather kernel is not worth it at these sizes.
    ids_tm = _pad_to(jnp.transpose(x_ids), (T, B_pad))       # (T, B_pad)
    u = e_proj[ids_tm]                                       # (T, B_pad, H_pad)

    # 3) Recurrence (only serial part runs in the sequential kernel).
    w_hh_p = _pad_to(w_hh_t, (H_pad, H_pad))
    hidden = rnn_recurrence(u, w_hh_p)                       # (T, B_pad, H_pad)

    # 4) Hoisted output projection over all (B*T) rows at once.
    hid_bm = jnp.transpose(hidden, (1, 0, 2)).reshape(B_pad * T, H_pad)
    w_lin_p = _pad_to(w_lin_t, (H_pad, V))
    logits = pallas_matmul_bias(hid_bm, w_lin_p, b_lin)      # (B_pad*T, V)

    # 5) Drop batch padding, match PyTorch's output.view(-1, vocab).
    return logits.reshape(B_pad, T, V)[:B].reshape(B * T, V)


# ---------------------------------------------------------------------------
# parameter init matching PyTorch defaults + pure-JAX reference
# ---------------------------------------------------------------------------
def init_params(key, vocab_size, input_size, hidden_size):
    k = jax.random.split(key, 7)
    bound = 1.0 / jnp.sqrt(hidden_size)
    embedding = jax.random.normal(k[0], (vocab_size, input_size), jnp.float32)
    w_ih = jax.random.uniform(k[1], (hidden_size, input_size), jnp.float32, -bound, bound)
    w_hh = jax.random.uniform(k[2], (hidden_size, hidden_size), jnp.float32, -bound, bound)
    b_ih = jax.random.uniform(k[3], (hidden_size,), jnp.float32, -bound, bound)
    b_hh = jax.random.uniform(k[4], (hidden_size,), jnp.float32, -bound, bound)
    w_lin = jax.random.uniform(k[5], (vocab_size, hidden_size), jnp.float32, -bound, bound)
    b_lin = jax.random.uniform(k[6], (vocab_size,), jnp.float32, -bound, bound)
    return {
        "embedding": embedding,
        "w_ih_t": w_ih.T,                          # (D_in, H)
        "w_hh_t": w_hh.T,                          # (H, H)
        "b_rnn": (b_ih + b_hh).reshape(1, -1),     # (1, H)
        "w_lin_t": w_lin.T,                        # (H, V)
        "b_lin": b_lin.reshape(1, -1),             # (1, V)
    }


def reference_forward(x_ids, params):
    emb = params["embedding"][x_ids]               # (B, T, D_in)
    B, T, _ = emb.shape
    H = params["w_hh_t"].shape[0]
    h = jnp.zeros((B, H), jnp.float32)
    outs = []
    for t in range(T):
        h = jnp.tanh(emb[:, t] @ params["w_ih_t"] + h @ params["w_hh_t"]
                     + params["b_rnn"])
        outs.append(h @ params["w_lin_t"] + params["b_lin"])
    out = jnp.stack(outs, axis=1)                  # (B, T, V)
    return out.reshape(-1, out.shape[-1])


if __name__ == "__main__":
    vocab_size, input_size, hidden_size = 32, 16, 32
    B, T = 2, 8

    key = jax.random.PRNGKey(0)
    kp, kx = jax.random.split(key)
    params = init_params(kp, vocab_size, input_size, hidden_size)
    x_ids = jax.random.randint(kx, (B, T), 0, vocab_size, dtype=jnp.int32)

    out = net_forward(x_ids, params)
    out = jax.block_until_ready(out)

    ref = reference_forward(x_ids, params)
    assert out.shape == (B * T, vocab_size)
    assert jnp.allclose(out, ref, atol=1e-3, rtol=1e-3)

    print("KERNEL_OK")
</pallas_src>

<mosaic_0001>
module attributes {stable_mosaic.version = 11 : i64} {
  func.func @matmul_bias_kernel(%arg0: i32, %arg1: i32, %arg2: i32, %arg3: memref<32x128xf32, #tpu.memory_space<vmem>>, %arg4: memref<128x128xf32, #tpu.memory_space<vmem>>, %arg5: memref<1x128xf32, #tpu.memory_space<vmem>>, %arg6: memref<32x128xf32, #tpu.memory_space<vmem>>, %arg7: memref<32x128xf32, #tpu.memory_space<vmem>>) attributes {dimension_semantics = [#tpu.dimension_semantics<parallel>, #tpu.dimension_semantics<parallel>, #tpu.dimension_semantics<arbitrary>], iteration_bounds = array<i64: 1, 1, 1>, scalar_prefetch = 0 : i64, scratch_operands = 1 : i64, tpu.core_type = #tpu.core_type<tc>, window_params = [{transform_indices = @transform_0, window_bounds = array<i64: 32, 128>}, {transform_indices = @transform_1, window_bounds = array<i64: 128, 128>}, {transform_indices = @transform_2, window_bounds = array<i64: 1, 128>}, {transform_indices = @transform_3, window_bounds = array<i64: 32, 128>}]} {
    %c0_i32 = arith.constant 0 : i32
    %0 = arith.cmpi eq, %arg2, %c0_i32 : i32
    %1 = arith.extui %0 : i1 to i32
    %c0_i32_0 = arith.constant 0 : i32
    %2 = arith.cmpi ne, %1, %c0_i32_0 : i32
    scf.if %2 {
      %cst_10 = arith.constant 0.000000e+00 : f32
      %12 = vector.broadcast %cst_10 : f32 to vector<32x128xf32>
      %c0_11 = arith.constant 0 : index
      %c0_12 = arith.constant 0 : index
      %13 = vector.load %arg7[%c0_11, %c0_12] : memref<32x128xf32, #tpu.memory_space<vmem>>, vector<32x128xf32>
      tpu.vector_store %arg7[%c0_11, %c0_12], %12 {strides = array<i32>} : memref<32x128xf32, #tpu.memory_space<vmem>>, vector<32x128xf32>,
    } else {
    }
    %c0 = arith.constant 0 : index
    %c0_1 = arith.constant 0 : index
    %3 = vector.load %arg7[%c0, %c0_1] : memref<32x128xf32, #tpu.memory_space<vmem>>, vector<32x128xf32>
    %c0_2 = arith.constant 0 : index
    %c0_3 = arith.constant 0 : index
    %4 = vector.load %arg3[%c0_2, %c0_3] : memref<32x128xf32, #tpu.memory_space<vmem>>, vector<32x128xf32>
    %c0_4 = arith.constant 0 : index
    %c0_5 = arith.constant 0 : index
    %5 = vector.load %arg4[%c0_4, %c0_5] : memref<128x128xf32, #tpu.memory_space<vmem>>, vector<128x128xf32>
    %cst = arith.constant dense<0.000000e+00> : vector<32x128xf32>
    %6 = tpu.matmul %4, %5, %cst {dimension_numbers = #tpu.dot_dimension_numbers<[1], [0], [0], [1], [0, 0, 1, 1], [], []>} : vector<32x128xf32>, vector<128x128xf32>, vector<32x128xf32> -> vector<32x128xf32>
    %7 = arith.addf %3, %6 : vector<32x128xf32>
    %c0_6 = arith.constant 0 : index
    %c0_7 = arith.constant 0 : index
    %8 = vector.load %arg7[%c0_6, %c0_7] : memref<32x128xf32, #tpu.memory_space<vmem>>, vector<32x128xf32>
    tpu.vector_store %arg7[%c0_6, %c0_7], %7 {strides = array<i32>} : memref<32x128xf32, #tpu.memory_space<vmem>>, vector<32x128xf32>,
    %c0_i32_8 = arith.constant 0 : i32
    %9 = arith.cmpi eq, %arg2, %c0_i32_8 : i32
    %10 = arith.extui %9 : i1 to i32
    %c0_i32_9 = arith.constant 0 : i32
    %11 = arith.cmpi ne, %10, %c0_i32_9 : i32
    scf.if %11 {
      %c0_10 = arith.constant 0 : index
      %c0_11 = arith.constant 0 : index
      %12 = vector.load %arg7[%c0_10, %c0_11] : memref<32x128xf32, #tpu.memory_space<vmem>>, vector<32x128xf32>
      %c0_12 = arith.constant 0 : index
      %c0_13 = arith.constant 0 : index
      %13 = vector.load %arg5[%c0_12, %c0_13] : memref<1x128xf32, #tpu.memory_space<vmem>>, vector<1x128xf32>
      %14 = vector.broadcast %13 : vector<1x128xf32> to vector<32x128xf32>
      %15 = arith.addf %12, %14 : vector<32x128xf32>
      %c0_14 = arith.constant 0 : index
      %c0_15 = arith.constant 0 : index
      %16 = vector.load %arg6[%c0_14, %c0_15] : memref<32x128xf32, #tpu.memory_space<vmem>>, vector<32x128xf32>
      tpu.vector_store %arg6[%c0_14, %c0_15], %15 {strides = array<i32>} : memref<32x128xf32, #tpu.memory_space<vmem>>, vector<32x128xf32>,
    } else {
    }
    return
  }
  func.func @transform_0(%arg0: i32, %arg1: i32, %arg2: i32) -> (i32, i32) {
    %c0_i32 = arith.constant 0 : i32
    return %arg0, %arg2 : i32, i32
  }
  func.func @transform_1(%arg0: i32, %arg1: i32, %arg2: i32) -> (i32, i32) {
    %c0_i32 = arith.constant 0 : i32
    return %arg2, %arg1 : i32, i32
  }
  func.func @transform_2(%arg0: i32, %arg1: i32, %arg2: i32) -> (i32, i32) {
    %c0_i32 = arith.constant 0 : i32
    %c0_i32_0 = arith.constant 0 : i32
    return %c0_i32, %arg1 : i32, i32
  }
  func.func @transform_3(%arg0: i32, %arg1: i32, %arg2: i32) -> (i32, i32) {
    %c0_i32 = arith.constant 0 : i32
    return %arg0, %arg1 : i32, i32
  }
}

</mosaic_0001>

<bundles_post_ra>
// kernel: tpu_custom_call.1
= control target key start
LH: loop header
LB: loop body
LE: loop exit
PB: predicated region body
PF: predicated region fallthrough
CT: control target
= control target key end

     0   :  { %8 = vsyncpa [#allocation4], 0  ;;  %s416_s0 = inlined_call_operand.hbm [shape: f32[32,128], index: 0, kind: input, shape index: {}]   ;;  %s417_s1 = inlined_call_operand.hbm [shape: f32[128,128], index: 1, kind: input, shape index: {}]   ;;  %s418_s2 = inlined_call_operand.vmem [shape: f32[1,128], index: 2, kind: input, shape index: {}]   ;;  %s419_s3 = inlined_call_operand.hbm [shape: f32[32,128], index: 3, kind: output, shape index: {}]  }
   0x1   :  { %9 = vsyncpa [#allocation7], 0 }
   0x2   :  { %10 = vsyncpa [#allocation5], 0  ;;  %s370_s12 = smov [#allocation3]  }
   0x3   :  { %s16_s13 = sshll.u32 %s370_s12, 4  ;;  %s17_s13 = int_to_ptr.vmem [resolvable:$true] %s16_s13 }
   0x4   :  { %s312_s14 = scalar_lea.vmem %s17_s13, 512  ;;  %p317_p1 = scmp.lt.s32.totalorder %s17_s13, %s17_s13 }
   0x5   :  { %p313_p0 = scmp.ne.s32.totalorder %s17_s13, %s312_s14  ;;  %p318_p2 = scmp.lt.s32.totalorder %s312_s14, %s312_s14 }
   0x7   :  { %p319_p3 = por %p318_p2, %p317_p1 }
   0x9   :  { %p320_p4 = pnand %p319_p3, %p313_p0 }
   0xb   :  { %323 = shalt.err (!%p320_p4)
}
   0xc   :  { %s371_s15 = smov 128   ;;  %s372_s16 = smov 8  }
   0xd   :  { %22 = dma.hbm_to_vmem [thread:$0]  %s416_s0, 512, %s17_s13, [#allocation4], %s371_s15, %s371_s15, %s372_s16  }
   0xe   :  { %s373_s19 = smov [#allocation6]  }
   0xf   :  { %s28_s20 = sshll.u32 %s373_s19, 4  ;;  %s29_s20 = int_to_ptr.vmem [resolvable:$true] %s28_s20 }
  0x10   :  { %s332_s21 = scalar_lea.vmem %s29_s20, 2048  ;;  %p337_p6 = scmp.lt.s32.totalorder %s29_s20, %s29_s20 }
  0x11   :  { %p333_p5 = scmp.ne.s32.totalorder %s29_s20, %s332_s21  ;;  %p338_p7 = scmp.lt.s32.totalorder %s332_s21, %s332_s21 }
  0x13   :  { %p339_p8 = por %p338_p7, %p337_p6 }
  0x15   :  { %p340_p9 = pnand %p339_p8, %p333_p5 }
  0x17   :  { %343 = shalt.err (!%p340_p9)
}
  0x18   :  { %34 = dma.hbm_to_vmem [thread:$0]  %s417_s1, 2048, %s29_s20, [#allocation7], %s371_s15, %s371_s15, %s372_s16  }
  0x19   :  { %364 = dma.done.wait [#allocation4], 512  }
  0x1a   :  { %365 = vsyncadd [#allocation4], 4294966784 }
  0x1b   :  { %366 = dma.done.wait [#allocation7], 2048  }
  0x1c   :  { %367 = vsyncadd [#allocation7], 4294965248  ;;  %v74_v0 = vld [vmem:[#allocation6 + $0x78] sm:$0xff]  ;;  %v73_v1 = vld [vmem:[#allocation6 + $0x70] sm:$0xff]  ;;  %s374_s24 = smov [#allocation8]  }
  0x1d   :  { %229 = vmatprep.subr.mxu0 %v74_v0  ;;  %267 = vmatprep.subr.mxu1 %v74_v0  ;;  %v72_v2 = vld [vmem:[#allocation6 + $0x68] sm:$0xff]  ;;  %v71_v3 = vld [vmem:[#allocation6 + $0x60] sm:$0xff]  ;;  %v70_v4 = vld [vmem:[#allocation6 + $0x58] sm:$0xff]  ;;  %s195_s25 = sshll.u32 %s374_s24, 4  ;;  %s196_s25 = int_to_ptr.vmem [resolvable:$true] %s195_s25 }
  0x1e   :  { %230 = vmatpush3.msra.mxu0 %v74_v0  ;;  %283 = vmatpush3.msra.mxu1 %v74_v0  ;;  %v69_v5 = vld [vmem:[#allocation6 + $0x50] sm:$0xff]  ;;  %v68_v6 = vld [vmem:[#allocation6 + $0x48] sm:$0xff]  ;;  %v67_v7 = vld [vmem:[#allocation6 + $0x40] sm:$0xff]  ;;  %s344_s26 = scalar_lea.vmem %s196_s25, 512  ;;  %p349_p11 = scmp.lt.s32.totalorder %s196_s25, %s196_s25 }
  0x1f   :  { %231 = vmatprep.subr.mxu0 %v73_v1  ;;  %268 = vmatprep.subr.mxu1 %v73_v1  ;;  %v66_v8 = vld [vmem:[#allocation6 + $0x38] sm:$0xff]  ;;  %v65_v9 = vld [vmem:[#allocation6 + $0x30] sm:$0xff]  ;;  %v64_v10 = vld [vmem:[#allocation6 + $0x28] sm:$0xff]  ;;  %p345_p10 = scmp.ne.s32.totalorder %s196_s25, %s344_s26  ;;  %p350_p12 = scmp.lt.s32.totalorder %s344_s26, %s344_s26 }
  0x20   :  { %232 = vmatpush3.msra.mxu0 %v73_v1  ;;  %284 = vmatpush3.msra.mxu1 %v73_v1  ;;  %v63_v11 = vld [vmem:[#allocation6 + $0x20] sm:$0xff]  ;;  %v62_v12 = vld [vmem:[#allocation6 + $0x18] sm:$0xff]  ;;  %v61_v13 = vld [vmem:[#allocation6 + $0x10] sm:$0xff] }
  0x21   :  { %233 = vmatprep.subr.mxu0 %v72_v2  ;;  %269 = vmatprep.subr.mxu1 %v72_v2  ;;  %v60_v14 = vld [vmem:[#allocation6 + $0x8] sm:$0xff]  ;;  %v59_v15 = vld [vmem:[#allocation6] sm:$0xff]  ;;  %v57_v17 = vld [vmem:[#allocation3 + $0x10] sm:$0xff]  ;;  %p351_p13 = por %p350_p12, %p349_p11 }
  0x22   :  { %234 = vmatpush3.msra.mxu0 %v72_v2  ;;  %285 = vmatpush3.msra.mxu1 %v72_v2  ;;  %v55_v16 = vld [vmem:[#allocation3] sm:$0xff]  ;;  %v56_v18 = vld [vmem:[#allocation3 + $0x8] sm:$0xff]  ;;  %v58_v19 = vld [vmem:[#allocation3 + $0x18] sm:$0xff] }
  0x23   :  { %235 = vmatprep.subr.mxu0 %v71_v3  ;;  %270 = vmatprep.subr.mxu1 %v71_v3  ;;  %v208_v20 = vld [vmem:[%s418_s2] ss:$0 sm:$0xff]  ;;  %p352_p0 = pnand %p351_p13, %p345_p10 }
  0x24   :  { %236 = vmatpush3.msra.mxu0 %v71_v3  ;;  %286 = vmatpush3.msra.mxu1 %v71_v3 }
  0x25   :  { %237 = vmatprep.subr.mxu0 %v70_v4  ;;  %271 = vmatprep.subr.mxu1 %v70_v4 }
  0x26   :  { %238 = vmatpush3.msra.mxu0 %v70_v4  ;;  %287 = vmatpush3.msra.mxu1 %v70_v4 }
  0x27   :  { %239 = vmatprep.subr.mxu0 %v69_v5  ;;  %272 = vmatprep.subr.mxu1 %v69_v5 }
  0x28   :  { %240 = vmatpush3.msra.mxu0 %v69_v5  ;;  %288 = vmatpush3.msra.mxu1 %v69_v5 }
  0x29   :  { %241 = vmatprep.subr.mxu0 %v68_v6  ;;  %273 = vmatprep.subr.mxu1 %v68_v6 }
  0x2a   :  { %242 = vmatpush3.msra.mxu0 %v68_v6  ;;  %289 = vmatpush3.msra.mxu1 %v68_v6 }
  0x2b   :  { %243 = vmatprep.subr.mxu0 %v67_v7  ;;  %274 = vmatprep.subr.mxu1 %v67_v7 }
  0x2c   :  { %244 = vmatpush3.msra.mxu0 %v67_v7  ;;  %290 = vmatpush3.msra.mxu1 %v67_v7 }
  0x2d   :  { %245 = vmatprep.subr.mxu0 %v66_v8  ;;  %275 = vmatprep.subr.mxu1 %v66_v8 }
  0x2e   :  { %246 = vmatpush3.msra.mxu0 %v66_v8  ;;  %291 = vmatpush3.msra.mxu1 %v66_v8 }
  0x2f   :  { %247 = vmatprep.subr.mxu0 %v65_v9  ;;  %276 = vmatprep.subr.mxu1 %v65_v9 }
  0x30   :  { %248 = vmatpush3.msra.mxu0 %v65_v9  ;;  %292 = vmatpush3.msra.mxu1 %v65_v9 }
  0x31   :  { %249 = vmatprep.subr.mxu0 %v64_v10  ;;  %277 = vmatprep.subr.mxu1 %v64_v10 }
  0x32   :  { %250 = vmatpush3.msra.mxu0 %v64_v10  ;;  %293 = vmatpush3.msra.mxu1 %v64_v10 }
  0x33   :  { %251 = vmatprep.subr.mxu0 %v63_v11  ;;  %278 = vmatprep.subr.mxu1 %v63_v11 }
  0x34   :  { %252 = vmatpush3.msra.mxu0 %v63_v11  ;;  %294 = vmatpush3.msra.mxu1 %v63_v11 }
  0x35   :  { %253 = vmatprep.subr.mxu0 %v62_v12  ;;  %279 = vmatprep.subr.mxu1 %v62_v12 }
  0x36   :  { %254 = vmatpush3.msra.mxu0 %v62_v12  ;;  %295 = vmatpush3.msra.mxu1 %v62_v12 }
  0x37   :  { %255 = vmatprep.subr.mxu0 %v61_v13  ;;  %280 = vmatprep.subr.mxu1 %v61_v13 }
  0x38   :  { %256 = vmatpush3.msra.mxu0 %v61_v13  ;;  %296 = vmatpush3.msra.mxu1 %v61_v13 }
  0x39   :  { %257 = vmatprep.subr.mxu0 %v60_v14  ;;  %281 = vmatprep.subr.mxu1 %v60_v14 }
  0x3a   :  { %258 = vmatpush3.msra.mxu0 %v60_v14  ;;  %297 = vmatpush3.msra.mxu1 %v60_v14 }
  0x3b   :  { %259 = vmatprep.subr.mxu0 %v59_v15  ;;  %282 = vmatprep.subr.mxu1 %v59_v15 }
  0x3c   :  { %260 = vmatpush3.msra.mxu0 %v59_v15  ;;  %298 = vmatpush3.msra.mxu1 %v59_v15 }
  0x3d   :  { %261 = vmatprep.mubr.f32.mxu0 %v55_v16  ;;  %264 = vmatprep.mubr.f32.mxu1 %v57_v17 }
  0x3e   :  { %262 = vmatmul.mubr.f32.vlgmr.msra.gmra.mxu0 %v56_v18  ;;  %265 = vmatmul.mubr.f32.vlgmr.msra.gmra.mxu1 %v58_v19 }
  0xfe   :  { %v263_v21 = vpop.f32.mrf.mxu0  ;;  %v266_v22 = vpop.f32.mrf.mxu1 }
  0xff   :  { %v183_v23 = vadd.f32 %v263_v21, %v208_v20  ;;  %v185_v24 = vadd.f32 %v266_v22, %v208_v20 }
 0x100   :  { %v141_v25 = vpop.f32.mrf.mxu0  ;;  %v151_v26 = vpop.f32.mrf.mxu1 }
 0x101   :  { %187 = vst [vmem:[#allocation8 + $0x8] sm:$0xff] %v183_v23  ;;  %189 = vst [vmem:[#allocation8 + $0x18] sm:$0xff] %v185_v24  ;;  %v182_v27 = vadd.f32 %v208_v20, %v141_v25  ;;  %v184_v28 = vadd.f32 %v208_v20, %v151_v26 }
 0x103   :  { %186 = vst [vmem:[#allocation8] sm:$0xff] %v182_v27  ;;  %188 = vst [vmem:[#allocation8 + $0x10] sm:$0xff] %v184_v28 }
 0x104   :  { %355 = shalt.err (!%p352_p0)
}
 0x105   :  { %201 = dma.vmem_to_hbm [thread:$0]  %s196_s25, 512, %s419_s3, [#allocation5], %s371_s15, %s371_s15, %s372_s16  }
 0x106   :  { %368 = dma.done.wait [#allocation5], 512  }
 0x107   :  { %369 = vsyncadd [#allocation5], 4294966784 }
 0x108   :  { %205 = vsyncpa [#allocation4], 1 }
 0x109   :  { %206 = vsyncpa [#allocation7], 1 }
 0x10a   :  { %207 = vsyncpa [#allocation5], 1 }

</bundles_post_ra>
